<compile_context>
chip_gen: v7x
topology: tpu7x:2x2x1
jax: 0.10.0
libtpu: 0.0.40
codegen_flags: <defaults>
</compile_context>

<pallas_src>
import jax
import jax.numpy as jnp
import numpy as np
from jax.experimental import pallas as pl
from jax.experimental.pallas import tpu as pltpu


def _quantised_input_kernel(x_ref,    # (tb, tk) bf16  analog activations
                            w_ref,    # (tk, th) bf16  weight tile (streamed)
                            b_ref,    # (1, th)  f32   bias
                            spk_ref,  # (tb, th) f32   speaker embedding rows
                            y_ref):   # (tb, th) f32   output, resident across k
    k = pl.program_id(2)

    @pl.when(k == 0)
    def _():
        # The f32 output block doubles as the accumulator (no scratch needed);
        # fold bias + speaker conditioning into the init.
        y_ref[...] = b_ref[...] + spk_ref[...]

    # bf16 x bf16 -> f32 MXU matmul, accumulated over the T (k) axis.
    y_ref[...] += jnp.dot(x_ref[...], w_ref[...],
                          preferred_element_type=jnp.float32)

    @pl.when(k == pl.num_programs(2) - 1)
    def _():
        y_ref[...] = jnp.tanh(y_ref[...])


def quantised_input_module_forward(digital_input, speaker,
                                    d2a_table, w, b, speaker_emb,
                                    *, tb=256, th=1024, tk=2048):
    """Forward of QuantisedInputModuleWrapper.

    digital_input: (B, T) int32 mu-law indices
    speaker:       (B,)   int32 speaker ids
    d2a_table:     (Q, 1) f32 learned Digital2Analog embedding
    w, b, speaker_emb: params of the speaker-conditioned linear+tanh stand-in model
    Returns (B, H) f32 -- the wrapped model's output (as in the PyTorch forward).
    """
    B, T = digital_input.shape
    H = w.shape[1]

    # ---- Digital2Analog: learned (Q,) embedding lookup (plain-JAX gather).
    # Feeding the (B, T) bf16 result to the kernel costs ~2 bytes/elem of HBM
    # traffic, vs. ~2*Q VALU ops/elem for an in-kernel select chain.
    table_flat = d2a_table.reshape(-1).astype(jnp.float32)          # (Q,)
    analog = jnp.take(table_flat, digital_input, axis=0).astype(jnp.bfloat16)

    # ---- tile selection: biggest tiles that fit, reduction (T) axis last.
    tb, th, tk = min(tb, B), min(th, H), min(tk, T)
    # Keep >= 2 blocks on a "parallel" grid axis so v7x's 2 TensorCores both
    # get work when tb == B collapses the batch axis.
    if B // tb == 1 and H // th == 1:
        if H % 256 == 0:
            th = H // 2
        elif B >= 16 and B % 16 == 0:
            tb = B // 2
    assert B % tb == 0 and H % th == 0 and T % tk == 0, \
        "tile sizes must divide shapes"

    w_bf16 = w.astype(jnp.bfloat16)
    b2d = b.reshape(1, H).astype(jnp.float32)
    # glue: per-example speaker embedding gather in plain JAX
    spk = jnp.take(speaker_emb, speaker, axis=0).astype(jnp.float32)  # (B, H)

    grid = (B // tb, H // th, T // tk)   # reduction (T) axis last

    # VMEM budget: double-buffered inputs + resident f32 output block.
    # Cap well under v7x's 64 MiB physical VMEM.
    vmem_need = (2 * (tb * tk * 2 + tk * th * 2 + tb * th * 4 + th * 4)
                 + tb * th * 4)
    vmem_limit = int(min(48 * 2**20, max(2 * vmem_need, 16 * 2**20)))

    cost = pl.CostEstimate(
        flops=2 * B * T * H,
        transcendentals=B * H,
        bytes_accessed=(B * T * 2 * (H // th)        # analog, re-read per H tile
                        + T * H * 2 * (B // tb)      # W, re-read per B tile
                        + 2 * B * H * 4 + H * 4))    # spk + out + bias

    y = pl.pallas_call(
        _quantised_input_kernel,
        out_shape=jax.ShapeDtypeStruct((B, H), jnp.float32),
        grid_spec=pltpu.PrefetchScalarGridSpec(
            num_scalar_prefetch=0,
            grid=grid,
            in_specs=[
                pl.BlockSpec((tb, tk), lambda i, j, k: (i, k)),   # analog (bf16)
                pl.BlockSpec((tk, th), lambda i, j, k: (k, j)),   # W (bf16)
                pl.BlockSpec((1, th),  lambda i, j, k: (0, j)),   # bias
                pl.BlockSpec((tb, th), lambda i, j, k: (i, j)),   # speaker emb
            ],
            out_specs=pl.BlockSpec((tb, th), lambda i, j, k: (i, j)),
        ),
        compiler_params=pltpu.CompilerParams(
            dimension_semantics=("parallel", "parallel", "arbitrary"),
            vmem_limit_bytes=vmem_limit),
        cost_estimate=cost,
    )(analog, w_bf16, b2d, spk)
    return y


if __name__ == "__main__":
    # Small shapes, but large enough to exercise the tiled grid.
    B, T, H = 16, 1024, 256
    Q = 256                       # num_input_quantization_channels (8-bit mu-law)
    NUM_SPEAKERS = 4

    key = jax.random.PRNGKey(0)
    k_idx, k_spk, k_tab, k_w, k_b, k_semb = jax.random.split(key, 6)

    digital_input = jax.random.randint(k_idx, (B, T), 0, Q, dtype=jnp.int32)
    speaker = jax.random.randint(k_spk, (B,), 0, NUM_SPEAKERS, dtype=jnp.int32)

    # deterministic parameters (Digital2Analog embedding + stand-in model params)
    d2a_table = jax.random.uniform(k_tab, (Q, 1), jnp.float32, -1.0, 1.0)
    w = jax.random.normal(k_w, (T, H), jnp.float32) * 0.05
    b = jax.random.normal(k_b, (1, H), jnp.float32) * 0.01
    speaker_emb = jax.random.normal(k_semb, (NUM_SPEAKERS, H), jnp.float32) * 0.1

    y = quantised_input_module_forward(
        digital_input, speaker, d2a_table, w, b, speaker_emb)
    jax.block_until_ready(y)

    # pure-JAX reference (same bf16 matmul inputs, f32 accumulation)
    analog_ref = d2a_table[digital_input, 0]
    y_ref = jnp.tanh(
        jnp.dot(analog_ref.astype(jnp.bfloat16), w.astype(jnp.bfloat16),
                preferred_element_type=jnp.float32)
        + b + speaker_emb[speaker])

    np.testing.assert_allclose(np.asarray(y), np.asarray(y_ref),
                               rtol=2e-3, atol=2e-3)
    print("KERNEL_OK")
</pallas_src>

<mosaic_0001>
module attributes {stable_mosaic.version = 11 : i64} {
  func.func @_quantised_input_kernel(%arg0: i32, %arg1: i32, %arg2: i32, %arg3: memref<16x1024xbf16, #tpu.memory_space<vmem>>, %arg4: memref<1024x128xbf16, #tpu.memory_space<vmem>>, %arg5: memref<1x128xf32, #tpu.memory_space<vmem>>, %arg6: memref<16x128xf32, #tpu.memory_space<vmem>>, %arg7: memref<16x128xf32, #tpu.memory_space<vmem>>) attributes {dimension_semantics = [#tpu.dimension_semantics<parallel>, #tpu.dimension_semantics<parallel>, #tpu.dimension_semantics<arbitrary>], iteration_bounds = array<i64: 1, 2, 1>, scalar_prefetch = 0 : i64, scratch_operands = 0 : i64, tpu.core_type = #tpu.core_type<tc>, window_params = [{transform_indices = @transform_0, window_bounds = array<i64: 16, 1024>}, {transform_indices = @transform_1, window_bounds = array<i64: 1024, 128>}, {transform_indices = @transform_2, window_bounds = array<i64: 1, 128>}, {transform_indices = @transform_3, window_bounds = array<i64: 16, 128>}, {transform_indices = @transform_4, window_bounds = array<i64: 16, 128>}]} {
    %c0_i32 = arith.constant 0 : i32
    %0 = arith.cmpi eq, %arg2, %c0_i32 : i32
    %1 = arith.extui %0 : i1 to i32
    %c0_i32_0 = arith.constant 0 : i32
    %2 = arith.cmpi ne, %1, %c0_i32_0 : i32
    scf.if %2 {
      %c0_10 = arith.constant 0 : index
      %c0_11 = arith.constant 0 : index
      %12 = vector.load %arg5[%c0_10, %c0_11] : memref<1x128xf32, #tpu.memory_space<vmem>>, vector<1x128xf32>
      %c0_12 = arith.constant 0 : index
      %c0_13 = arith.constant 0 : index
      %13 = vector.load %arg6[%c0_12, %c0_13] : memref<16x128xf32, #tpu.memory_space<vmem>>, vector<16x128xf32>
      %14 = vector.broadcast %12 : vector<1x128xf32> to vector<16x128xf32>
      %15 = arith.addf %14, %13 : vector<16x128xf32>
      %c0_14 = arith.constant 0 : index
      %c0_15 = arith.constant 0 : index
      %16 = vector.load %arg7[%c0_14, %c0_15] : memref<16x128xf32, #tpu.memory_space<vmem>>, vector<16x128xf32>
      tpu.vector_store %arg7[%c0_14, %c0_15], %15 {strides = array<i32>} : memref<16x128xf32, #tpu.memory_space<vmem>>, vector<16x128xf32>,
    } else {
    }
    %c0 = arith.constant 0 : index
    %c0_1 = arith.constant 0 : index
    %3 = vector.load %arg7[%c0, %c0_1] : memref<16x128xf32, #tpu.memory_space<vmem>>, vector<16x128xf32>
    %c0_2 = arith.constant 0 : index
    %c0_3 = arith.constant 0 : index
    %4 = vector.load %arg3[%c0_2, %c0_3] : memref<16x1024xbf16, #tpu.memory_space<vmem>>, vector<16x1024xbf16>
    %c0_4 = arith.constant 0 : index
    %c0_5 = arith.constant 0 : index
    %5 = vector.load %arg4[%c0_4, %c0_5] : memref<1024x128xbf16, #tpu.memory_space<vmem>>, vector<1024x128xbf16>
    %cst = arith.constant dense<0.000000e+00> : vector<16x128xf32>
    %6 = tpu.matmul %4, %5, %cst {dimension_numbers = #tpu.dot_dimension_numbers<[1], [0], [0], [1], [0, 0, 1, 1], [], []>} : vector<16x1024xbf16>, vector<1024x128xbf16>, vector<16x128xf32> -> vector<16x128xf32>
    %7 = arith.addf %3, %6 : vector<16x128xf32>
    %c0_6 = arith.constant 0 : index
    %c0_7 = arith.constant 0 : index
    %8 = vector.load %arg7[%c0_6, %c0_7] : memref<16x128xf32, #tpu.memory_space<vmem>>, vector<16x128xf32>
    tpu.vector_store %arg7[%c0_6, %c0_7], %7 {strides = array<i32>} : memref<16x128xf32, #tpu.memory_space<vmem>>, vector<16x128xf32>,
    %c0_i32_8 = arith.constant 0 : i32
    %9 = arith.cmpi eq, %arg2, %c0_i32_8 : i32
    %10 = arith.extui %9 : i1 to i32
    %c0_i32_9 = arith.constant 0 : i32
    %11 = arith.cmpi ne, %10, %c0_i32_9 : i32
    scf.if %11 {
      %c0_10 = arith.constant 0 : index
      %c0_11 = arith.constant 0 : index
      %12 = vector.load %arg7[%c0_10, %c0_11] : memref<16x128xf32, #tpu.memory_space<vmem>>, vector<16x128xf32>
      %13 = math.tanh %12 : vector<16x128xf32>
      %c0_12 = arith.constant 0 : index
      %c0_13 = arith.constant 0 : index
      %14 = vector.load %arg7[%c0_12, %c0_13] : memref<16x128xf32, #tpu.memory_space<vmem>>, vector<16x128xf32>
      tpu.vector_store %arg7[%c0_12, %c0_13], %13 {strides = array<i32>} : memref<16x128xf32, #tpu.memory_space<vmem>>, vector<16x128xf32>,
    } else {
    }
    return
  }
  func.func @transform_0(%arg0: i32, %arg1: i32, %arg2: i32) -> (i32, i32) {
    %c0_i32 = arith.constant 0 : i32
    return %arg0, %arg2 : i32, i32
  }
  func.func @transform_1(%arg0: i32, %arg1: i32, %arg2: i32) -> (i32, i32) {
    %c0_i32 = arith.constant 0 : i32
    return %arg2, %arg1 : i32, i32
  }
  func.func @transform_2(%arg0: i32, %arg1: i32, %arg2: i32) -> (i32, i32) {
    %c0_i32 = arith.constant 0 : i32
    %c0_i32_0 = arith.constant 0 : i32
    return %c0_i32, %arg1 : i32, i32
  }
  func.func @transform_3(%arg0: i32, %arg1: i32, %arg2: i32) -> (i32, i32) {
    %c0_i32 = arith.constant 0 : i32
    return %arg0, %arg1 : i32, i32
  }
  func.func @transform_4(%arg0: i32, %arg1: i32, %arg2: i32) -> (i32, i32) {
    %c0_i32 = arith.constant 0 : i32
    return %arg0, %arg1 : i32, i32
  }
}

</mosaic_0001>

<bundles_post_ra>
// kernel: tpu_custom_call.1
= control target key start
LH: loop header
LB: loop body
LE: loop exit
PB: predicated region body
PF: predicated region fallthrough
CT: control target
= control target key end

     0   :  { %s2119_s0 = inlined_call_operand.hbm [shape: bf16[16,1024], index: 0, kind: input, shape index: {}]   ;;  %s2120_s1 = inlined_call_operand.hbm [shape: bf16[1024,256], index: 1, kind: input, shape index: {}]   ;;  %s2121_s2 = inlined_call_operand.vmem [shape: f32[1,256], index: 2, kind: input, shape index: {}]   ;;  %s2122_s3 = inlined_call_operand.hbm [shape: f32[16,256], index: 3, kind: input, shape index: {}]   ;;  %s2123_s4 = inlined_call_operand.hbm [shape: f32[16,256], index: 4, kind: output, shape index: {}]  }
   0x1   :  { %2130 = sst [smem:[#allocation13_spill]] %s2120_s1 }
   0x2   :  { %2131 = sst [smem:[#allocation14_spill]] %s2122_s3 }
   0x3   :  { %9 = vsyncpa [#allocation3], 0 }
   0x4   :  { %10 = vsyncpa [#allocation6], 0 }
   0x5   :  { %12 = vsyncpa [#allocation6 + $0x1], 0 }
   0x6   :  { %13 = vsyncpa [#allocation4], 0 }
   0x7   :  { %15 = vsyncpa [#allocation4 + $0x1], 0  ;;  %s1788_s15 = smov 0   ;;  %s1790_s16 = smov 0  }
   0x8   :  { %s1792_s17 = smov 0   ;;  %s1794_s18 = smov 0  }
   0x9   :  { %s1796_s19 = smov 0   ;;  %s1798_s20 = smov 0  }
   0xa LB: > { %s36_s21 = sadd.s32 1, %s1743_s19  ;;  %s77_s22 = sadd.s32 1, %s1735_s17  ;;  %s1747_s20 = sphi %s1798_s20, %s21_s20   ;;  %s1743_s19 = sphi %s1796_s19, %s2154_s19   ;;  %s1739_s18 = sphi %s1794_s18, %s2153_s18   ;;  %s1735_s17 = sphi %s1792_s17, %s2152_s17   ;;  %s1731_s16 = sphi %s1790_s16, %s2151_s16   ;;  %s1727_s15 = sphi %s1788_s15, %s2150_s15  }
   0xb   : > { %p38_p0 = scmp.ge.s32.totalorder %s36_s21, 2  ;;  %p84_p1 = scmp.ne.s32.totalorder %s1735_s17, %s1731_s16 }
   0xc   : > { %p85_p2 = scmp.eq.s32.totalorder %s1747_s20, 0  ;;  %p1443_p5 = scmp.lt.s32.totalorder %s1747_s20, 2 }
   0xd   : > { %s2156_s21 = smov (%p38_p0, %s36_s21), 0  ;;  %s215_s24 = sand.u32 1, %s1747_s20  }
   0xe   : > { %2132 = sst [smem:[#allocation12_spill]] %s2156_s21  ;;  %p86_p4 = por %p85_p2, %p84_p1 }
   0xf   : > { %s73_s23 = ssub.s32 %s1743_s19, %s2156_s21  ;;  %s217_s25 = sand.u32 1, %s1735_s17  }
  0x10   : > { %p75_p6 = scmp.eq.s32.totalorder %s73_s23, 0  ;;  %s1244_s26 = sshll.u32 %s1743_s19, 6 }
  0x11   : > { %s1243_s28 = sshll.u32 %s217_s25, 9  ;;  %s2133_s1 = sld [smem:[#allocation13_spill]] }
  0x12   : > { %s1836_s27 = scalar_select %p75_p6, %s1735_s17, %s77_s22  }
  0x13   : > { %p1845_p7 = pnand %p1443_p5, %p86_p4  ;;  %s219_s7 = scalar_lea.vmem [#allocation5], %s1243_s28 }
  0x14   : > { %s228_s8 = sshll.u32 %s219_s7, 4  ;;  %s1851_s9 = scalar_lea.sflag [#allocation6], %s215_s24  ;;  %s1849_s8 = int_to_ptr.vmem [resolvable:$true] %s228_s8 }
  0x15   : > { %p1575_p9 = pneg %p1845_p7 }
  0x17   : > { %s1843_s5 = scalar_lea.hbm %s2133_s1, %s1244_s26  ;;  %s1578_s13 = scalar_lea.hbm %s2133_s1, 16384 }
  0x18   : > { %s1573_s10 = scalar_lea.hbm %s1843_s5, 8192  ;;  %p1579_p12 = scmp.lt.u32.totalorder %s1843_s5, %s2133_s1 }
  0x19   : > { %p1574_p8 = scmp.ne.s32.totalorder %s1843_s5, %s1573_s10  ;;  %p1580_p13 = scmp.lt.u32.totalorder %s1578_s13, %s1573_s10 }
  0x1a   : > { %p1582_p2 = scmp.lt.u32.totalorder %s1573_s10, %s1843_s5 }
  0x1b   : > { %p1576_p10 = pnand %p1575_p9, %p1574_p8  ;;  %p1581_p0 = por %p1580_p13, %p1579_p12 }
  0x1d   : > { %p1577_p11 = pneg %p1576_p10  ;;  %p1583_p4 = por %p1582_p2, %p1581_p0 }
  0x1f   : > { %p1584_p5 = pnand %p1583_p4, %p1577_p11 }
  0x21   : > { %1587 = shalt.err (!%p1584_p5)
}
  0x22   : > { %s1588_s23 = scalar_lea.vmem %s1849_s8, 8192  ;;  %s1749_s24 = smov [#allocation5]  }
  0x23   : > { %p1589_p6 = scmp.ne.s32.totalorder %s1849_s8, %s1588_s23  ;;  %s1593_s26 = sshll.u32 %s1749_s24, 4  ;;  %s1594_s26 = int_to_ptr.vmem [resolvable:$false] %s1593_s26 }
  0x24   : > { %s1595_s28 = scalar_lea.vmem %s1594_s26, 16384  ;;  %p1596_p3 = scmp.lt.s32.totalorder %s1849_s8, %s1594_s26 }
  0x25   : > { %p1591_p8 = pnand %p1589_p6, %p1575_p9  ;;  %p1597_p12 = scmp.lt.s32.totalorder %s1595_s28, %s1588_s23 }
  0x27   : > { %p1592_p10 = pneg %p1591_p8  ;;  %p1598_p13 = por %p1597_p12, %p1596_p3 }
  0x29   : > { %p1599_p0 = pnand %p1598_p13, %p1592_p10 }
  0x2b   : > { %1602 = shalt.err (!%p1599_p0)
}
  0x2c   : > { %s2126_s29 = smov 128   ;;  %s1751_s30 = smov 64  }
  0x2d   : > { %s1752_s7 = smov 4   ;;  %s1245_s10 = sshll.u32 %s217_s25, 4 }
  0x2e   : > { %1434 = dma.hbm_to_vmem [thread:$0]  (!%p1845_p7), %s1843_s5, 8192, %s1849_s8, %s1851_s9, %s2126_s29, %s1751_s30, %s1752_s7  }
  0x2f   : > { %s248_s11 = scalar_lea.vmem [#allocation7], %s1245_s10  ;;  %s1885_s13 = sadd.s32 4294967295, %s1747_s20  }
  0x30   : > { %s257_s12 = sshll.u32 %s248_s11, 4  ;;  %s1239_s14 = sadd.s32 4294967294, %s1747_s20   ;;  %s1882_s12 = int_to_ptr.vmem [resolvable:$true] %s257_s12 }
  0x31   : > { %p90_p3 = scmp.ne.s32.totalorder %s1731_s16, %s1727_s15  ;;  %p2124_p11 = scmp.eq.s32.totalorder %s1885_s13, 0 }
  0x32   : > { %p170_p2 = scmp.eq.s32.totalorder %s1885_s13, 1  ;;  %p176_p4 = scmp.eq.s32.totalorder %s1239_s14, 1 }
  0x33   : > { %p1894_p5 = por %p2124_p11, %p90_p3  ;;  %p1240_p6 = scmp.ge.s32.totalorder %s1747_s20, 1 }
  0x34   : > { %p1902_p8 = por %p170_p2, %p84_p1  ;;  %p1906_p10 = por %p176_p4, %p90_p3 }
  0x35   : > { %s2135_s25 = scalar_select %p1894_p5, 1, 0 }
  0x36   : > { %s2136_s5 = scalar_select %p1902_p8, 1, 0 }
  0x37   : > { %s2137_s8 = scalar_select %p1906_p10, 1, 0 }
  0x38   : > { %p183_p12 = scmp.lt.s32.totalorder %s1747_s20, 3  ;;  %s1753_s23 = smov [#allocation2]  }
  0x39   : > { %s201_s24 = sshll.u32 %s1753_s23, 4  ;;  %s1246_s26 = sshll.u32 %s1743_s19, 7  ;;  %s1915_s24 = int_to_ptr.vmem [resolvable:$true] %s201_s24 }
  0x3a   : > { %p1911_p13 = pnand %p1240_p6, %p183_p12  ;;  %s2139_s3 = sld [smem:[#allocation14_spill]] }
  0x3c   : > { %s2138_s22 = scalar_select %p1911_p13, 1, 0 }
  0x3d   : > { %p1427_p0 = pneg %p1911_p13 }
  0x3f   : > { %p1927_p1 = pnand %p1427_p0, %p2124_p11 }
  0x40   : > { %s1923_s7 = scalar_lea.hbm %s2139_s3, %s1246_s26  ;;  %s1608_s26 = scalar_lea.hbm %s2139_s3, 512 }
  0x41   : > { %s1603_s11 = scalar_lea.hbm %s1923_s7, 256  ;;  %p1609_p6 = scmp.lt.u32.totalorder %s1923_s7, %s2139_s3 }
  0x42   : > { %p1604_p3 = scmp.ne.s32.totalorder %s1923_s7, %s1603_s11  ;;  %p1610_p12 = scmp.lt.u32.totalorder %s1608_s26, %s1603_s11 }
  0x43   : > { %p1612_p0 = scmp.lt.u32.totalorder %s1603_s11, %s1923_s7 }
  0x44   : > { %p1606_p2 = pnand %p1604_p3, %p1575_p9  ;;  %p1611_p10 = por %p1610_p12, %p1609_p6 }
  0x46   : > { %p1607_p4 = pneg %p1606_p2  ;;  %p1613_p11 = por %p1612_p0, %p1611_p10 }
  0x48   : > { %p1614_p8 = pnand %p1613_p11, %p1607_p4 }
  0x4a   : > { %1617 = shalt.err (!%p1614_p8)
}
  0x4b   : > { %s1618_s29 = scalar_lea.vmem %s1882_s12, 256  ;;  %s1754_s14 = smov [#allocation7]  }
  0x4c   : > { %p1619_p3 = scmp.ne.s32.totalorder %s1882_s12, %s1618_s29  ;;  %s1623_s23 = sshll.u32 %s1754_s14, 4  ;;  %s1624_s23 = int_to_ptr.vmem [resolvable:$false] %s1623_s23 }
  0x4d   : > { %s1625_s28 = scalar_lea.vmem %s1624_s23, 512  ;;  %p1626_p13 = scmp.lt.s32.totalorder %s1882_s12, %s1624_s23 }
  0x4e   : > { %p1621_p2 = pnand %p1619_p3, %p1575_p9  ;;  %p1627_p6 = scmp.lt.s32.totalorder %s1625_s28, %s1618_s29 }
  0x50   : > { %p1622_p5 = pneg %p1621_p2  ;;  %p1628_p12 = por %p1627_p6, %p1626_p13 }
  0x52   : > { %p1629_p10 = pnand %p1628_p12, %p1622_p5 }
  0x54   : > { %1632 = shalt.err (!%p1629_p10)
}
  0x55   : > { %s1755_s11 = smov 256   ;;  %s1756_s26 = smov 8  }
  0x56   : > { %s2141_s30 = smov 128   ;;  %s1633_s14 = scalar_lea.hbm %s2119_s0, 1024 }
  0x57   : > { %1437 = dma.hbm_to_vmem [thread:$0]  (!%p1845_p7), %s1923_s7, 256, %s1882_s12, %s1851_s9, %s1755_s11, %s2141_s30, %s1756_s26  }
  0x58   : > { %p1634_p9 = scmp.ne.s32.totalorder %s2119_s0, %s1633_s14  ;;  %p1635_p11 = pneg %p1927_p1 }
  0x59   : > { %p1640_p13 = scmp.lt.u32.totalorder %s1633_s14, %s2119_s0 }
  0x5a   : > { %p1636_p5 = pnand %p1635_p11, %p1634_p9 }
  0x5c   : > { %p1637_p8 = pneg %p1636_p5 }
  0x5e   : > { %p1642_p4 = pnand %p1640_p13, %p1637_p8 }
  0x60   : > { %1645 = shalt.err (!%p1642_p4)
}
  0x61   : > { %s1646_s6 = scalar_lea.vmem %s1915_s24, 1024  ;;  %p1654_p2 = scmp.lt.s32.totalorder %s1915_s24, %s1915_s24 }
  0x62   : > { %p1647_p7 = scmp.ne.s32.totalorder %s1915_s24, %s1646_s6  ;;  %p1655_p6 = scmp.lt.s32.totalorder %s1646_s6, %s1646_s6 }
  0x64   : > { %p1649_p0 = pnand %p1647_p7, %p1635_p11  ;;  %p1656_p12 = por %p1655_p6, %p1654_p2 }
  0x66   : > { %p1650_p3 = pneg %p1649_p0 }
  0x68   : > { %p1657_p10 = pnand %p1656_p12, %p1650_p3 }
  0x6a   : > { %1660 = shalt.err (!%p1657_p10)
}
  0x6b   : > { %s1757_s1 = smov 512   ;;  %s1758_s3 = smov 32  }
  0x6c   : > { %1430 = dma.hbm_to_vmem [thread:$0]  (!%p1927_p1), %s2119_s0, 1024, %s1915_s24, [#allocation3], %s1757_s1, %s1757_s1, %s1758_s3  }
  0x6d   : > { %p2142_p9 = scmp.ne.s32.totalorder %s2138_s22, 0 }
  0x6e   : > { %p2143_p11 = scmp.eq.s32.totalorder (!%p2142_p9), %s1885_s13, 0 }
  0x6f   : > { %269 = sbr.rel (%p2142_p9) target bundleno = 440 (0x1b8), region = 36 }
  0x76   : > { %1714 = dma.done.wait (%p2143_p11), [#allocation3], 1024   ;;  %p2144_p5 = pmov %p2143_p11 }
  0x77   : > { %s275_s12 = sand.u32 1, %s1885_s13   ;;  %s1985_s7 = sand.u32 1, %s1731_s16  }
  0x78   : > { %1716 = vsyncadd (%p2144_p5), [#allocation3], 4294966272  ;;  %s1249_s10 = sshll.u32 %s1985_s7, 9  ;;  %s276_s11 = scalar_lea.sflag [#allocation6], %s275_s12 }
  0x79   : > { %s1988_s26 = scalar_lea.vmem [#allocation5], %s1249_s10  ;;  %p2145_p1 = scmp.ne.s32.totalorder %s2135_s25, 0 }
  0x7b   : > { %1718 = dma.done.wait (%p2145_p1), %s276_s11, 8448  }
  0x7c   : > { %1720 = vsyncadd (%p2145_p1), %s276_s11, 4294958848  ;;  %v1505_v0 = vld [vmem:[%s1988_s26 + $0x40] sm:$0xff]   ;;  %v1509_v4 = vld [vmem:[%s1988_s26 + $0x48] sm:$0xff]   ;;  %p324_p8 = scmp.lt.s32.totalorder %s1739_s18, 1  ;;  %s1250_s25 = sshll.u32 %s1985_s7, 4 }
  0x7d   : > { %v1506_v1 = vld [vmem:[%s1988_s26 + $0xc0] sm:$0xff]   ;;  %1329 = vmatprep.subr.bf16.mxu0 %v1505_v0  ;;  %v1510_v5 = vld [vmem:[%s1988_s26 + $0xc8] sm:$0xff]   ;;  %v1513_v8 = vld [vmem:[%s1988_s26 + $0x50] sm:$0xff]   ;;  %s288_s14 = scalar_lea.vmem [#allocation7], %s1250_s25  ;;  %s1326_s23 = sshll.u32 %s1739_s18, 7 }
  0x7e   : > { %v1507_v2 = vld [vmem:[%s1988_s26] sm:$0xff]   ;;  %1351 = vmatprep.subr.bf16.mxu1 %v1506_v1  ;;  %v1511_v6 = vld [vmem:[%s1988_s26 + $0x8] sm:$0xff]   ;;  %v1514_v9 = vld [vmem:[%s1988_s26 + $0xd0] sm:$0xff]   ;;  %s325_s13 = scalar_select %p324_p8, %s1739_s18, 1 }
  0x7f   : > { %v1508_v3 = vld [vmem:[%s1988_s26 + $0x80] sm:$0xff]   ;;  %1330 = vmatpush3.bf16.msra.mxu0 %v1507_v2  ;;  %v1512_v7 = vld [vmem:[%s1988_s26 + $0x88] sm:$0xff]   ;;  %v1515_v10 = vld [vmem:[%s1988_s26 + $0x10] sm:$0xff]   ;;  %s320_s29 = scalar_lea.vmem [#allocation8], %s1250_s25  ;;  %s2068_s3 = scalar_lea.hbm %s2123_s4, %s1326_s23 }
  0x80   : > { %1352 = vmatpush3.bf16.msra.mxu1 %v1508_v3  ;;  %1331 = vmatprep.subr.bf16.mxu0 %v1509_v4  ;;  %v1516_v11 = vld [vmem:[%s1988_s26 + $0x90] sm:$0xff]   ;;  %v1517_v12 = vld [vmem:[%s1988_s26 + $0x58] sm:$0xff]   ;;  %v1521_v16 = vld [vmem:[%s1988_s26 + $0x60] sm:$0xff]   ;;  %s326_s30 = scalar_lea.vmem %s2121_s2, %s325_s13  ;;  %s1102_s28 = sshll.u32 %s320_s29, 4  ;;  %s2070_s28 = int_to_ptr.vmem [resolvable:$true] %s1102_s28 }
  0x81   : > { %1353 = vmatprep.subr.bf16.mxu1 %v1510_v5  ;;  %v1518_v13 = vld [vmem:[%s1988_s26 + $0xd8] sm:$0xff]   ;;  %v1522_v17 = vld [vmem:[%s1988_s26 + $0xe0] sm:$0xff]   ;;  %v1525_v20 = vld [vmem:[%s1988_s26 + $0x68] sm:$0xff]   ;;  %s1087_s21 = scalar_lea.sflag [#allocation4], %s1985_s7  ;;  %s1661_s9 = scalar_lea.vmem %s2070_s28, 256 }
  0x82   : > { %v1519_v14 = vld [vmem:[%s1988_s26 + $0x18] sm:$0xff]   ;;  %v1523_v18 = vld [vmem:[%s1988_s26 + $0x20] sm:$0xff]   ;;  %v1526_v21 = vld [vmem:[%s1988_s26 + $0xe8] sm:$0xff]   ;;  %p1662_p13 = scmp.ne.s32.totalorder %s2070_s28, %s1661_s9  ;;  %p2146_p4 = scmp.ne.s32.totalorder %s2136_s5, 0 }
  0x83   : > { %1332 = vmatpush3.bf16.msra.mxu0 %v1511_v6  ;;  %v1520_v15 = vld [vmem:[%s1988_s26 + $0x98] sm:$0xff]   ;;  %v1524_v19 = vld [vmem:[%s1988_s26 + $0xa0] sm:$0xff]   ;;  %v1527_v22 = vld [vmem:[%s1988_s26 + $0x28] sm:$0xff]   ;;  %s1759_s18 = smov [#allocation8]  }
  0x84   : > { %1354 = vmatpush3.bf16.msra.mxu1 %v1512_v7  ;;  %1333 = vmatprep.subr.bf16.mxu0 %v1513_v8  ;;  %v1528_v23 = vld [vmem:[%s1988_s26 + $0xa8] sm:$0xff]   ;;  %v1529_v24 = vld [vmem:[%s1988_s26 + $0x70] sm:$0xff]   ;;  %v1533_v28 = vld [vmem:[%s1988_s26 + $0x78] sm:$0xff]   ;;  %p1663_p7 = pnand %p1662_p13, %p2146_p4  ;;  %s1665_s12 = sshll.u32 %s1759_s18, 4  ;;  %s1666_s12 = int_to_ptr.vmem [resolvable:$false] %s1665_s12 }
  0x85   : > { %1355 = vmatprep.subr.bf16.mxu1 %v1514_v9  ;;  %v1530_v25 = vld [vmem:[%s1988_s26 + $0xf0] sm:$0xff]   ;;  %v1534_v29 = vld [vmem:[%s1988_s26 + $0xf8] sm:$0xff]   ;;  %v349_v32 = vld [vmem:[#allocation2] sm:$0xff]  ;;  %s1667_s10 = scalar_lea.vmem %s1666_s12, 512  ;;  %p1668_p3 = scmp.lt.s32.totalorder %s2070_s28, %s1666_s12 }
  0x86   : > { %v1531_v26 = vld [vmem:[%s1988_s26 + $0x30] sm:$0xff]   ;;  %v1535_v30 = vld [vmem:[%s1988_s26 + $0x38] sm:$0xff]   ;;  %v353_v33 = vld [vmem:[#allocation2 + $0x20] sm:$0xff]  ;;  %p1664_p0 = pneg %p1663_p7  ;;  %p1669_p2 = scmp.lt.s32.totalorder %s1667_s10, %s1661_s9 }
  0x87   : > { %1334 = vmatpush3.bf16.msra.mxu0 %v1515_v10  ;;  %v1532_v27 = vld [vmem:[%s1988_s26 + $0xb0] sm:$0xff]   ;;  %v1536_v31 = vld [vmem:[%s1988_s26 + $0xb8] sm:$0xff]   ;;  %v350_v34 = vld [vmem:[#allocation2 + $0x8] sm:$0xff]  ;;  %v1253_v35 = vcombine.low %v349_v32, %v353_v33  ;;  %v1254_v36 = vcombine.high %v349_v32, %v353_v33 }
  0x88   : > { %1356 = vmatpush3.bf16.msra.mxu1 %v1516_v11  ;;  %1335 = vmatprep.subr.bf16.mxu0 %v1517_v12  ;;  %v354_v37 = vld [vmem:[#allocation2 + $0x28] sm:$0xff]  ;;  %v1537_v40 = vld [vmem:[%s1988_s26 + $0x140] sm:$0xff]   ;;  %v1545_v48 = vld [vmem:[%s1988_s26 + $0x150] sm:$0xff]   ;;  %p1670_p6 = por %p1669_p2, %p1668_p3 }
  0x89   : > { %1357 = vmatprep.subr.bf16.mxu1 %v1518_v13  ;;  %v1255_v38 = vcombine.low %v350_v34, %v354_v37  ;;  %v1256_v39 = vcombine.high %v350_v34, %v354_v37  ;;  %941 = vmatprep.mubr.bf16.mxu0 %v1254_v36  ;;  %v1538_v41 = vld [vmem:[%s1988_s26 + $0x1c0] sm:$0xff]   ;;  %v1541_v44 = vld [vmem:[%s1988_s26 + $0x148] sm:$0xff]   ;;  %v1546_v49 = vld [vmem:[%s1988_s26 + $0x1d0] sm:$0xff]  }
  0x8a   : > { %v1539_v42 = vld [vmem:[%s1988_s26 + $0x100] sm:$0xff]   ;;  %v1542_v45 = vld [vmem:[%s1988_s26 + $0x1c8] sm:$0xff]   ;;  %v1547_v50 = vld [vmem:[%s1988_s26 + $0x110] sm:$0xff]   ;;  %p1671_p12 = pnand %p1670_p6, %p1664_p0 }
  0x8b   : > { %1336 = vmatpush3.bf16.msra.mxu0 %v1519_v14  ;;  %982 = vmatprep.mubr.bf16.mxu1 %v1256_v39  ;;  %v1540_v43 = vld [vmem:[%s1988_s26 + $0x180] sm:$0xff]   ;;  %v1543_v46 = vld [vmem:[%s1988_s26 + $0x108] sm:$0xff]   ;;  %v1548_v51 = vld [vmem:[%s1988_s26 + $0x190] sm:$0xff]  }
  0x8c   : > { %1358 = vmatpush3.bf16.msra.mxu1 %v1520_v15  ;;  %1337 = vmatprep.subr.bf16.mxu0 %v1521_v16  ;;  %v1544_v47 = vld [vmem:[%s1988_s26 + $0x188] sm:$0xff]   ;;  %v1549_v52 = vld [vmem:[%s1988_s26 + $0x158] sm:$0xff]   ;;  %v1553_v56 = vld [vmem:[%s1988_s26 + $0x160] sm:$0xff]  }
  0x8d   : > { %1359 = vmatprep.subr.bf16.mxu1 %v1522_v17  ;;  %v1550_v53 = vld [vmem:[%s1988_s26 + $0x1d8] sm:$0xff]   ;;  %v1554_v57 = vld [vmem:[%s1988_s26 + $0x1e0] sm:$0xff]   ;;  %v1557_v60 = vld [vmem:[%s1988_s26 + $0x168] sm:$0xff]  }
  0x8e   : > { %v1551_v54 = vld [vmem:[%s1988_s26 + $0x118] sm:$0xff]   ;;  %v1555_v58 = vld [vmem:[%s1988_s26 + $0x120] sm:$0xff]   ;;  %v1558_v61 = vld [vmem:[%s1988_s26 + $0x1e8] sm:$0xff]  }
  0x8f   : > { %1338 = vmatpush3.bf16.msra.mxu0 %v1523_v18  ;;  %v1552_v55 = vld [vmem:[%s1988_s26 + $0x198] sm:$0xff]   ;;  %v1556_v59 = vld [vmem:[%s1988_s26 + $0x1a0] sm:$0xff]   ;;  %v1559_v62 = vld [vmem:[%s1988_s26 + $0x128] sm:$0xff]  }
  0x90   : > { %1360 = vmatpush3.bf16.msra.mxu1 %v1524_v19  ;;  %1339 = vmatprep.subr.bf16.mxu0 %v1525_v20  ;;  %v1560_v63 = vld [vmem:[%s1988_s26 + $0x1a8] sm:$0xff]   ;;  %v1561_v0 = vld [vmem:[%s1988_s26 + $0x170] sm:$0xff]   ;;  %v1565_v4 = vld [vmem:[%s1988_s26 + $0x178] sm:$0xff]  }
  0x91   : > { %1361 = vmatprep.subr.bf16.mxu1 %v1526_v21  ;;  %v1562_v1 = vld [vmem:[%s1988_s26 + $0x1f0] sm:$0xff]   ;;  %v1566_v5 = vld [vmem:[%s1988_s26 + $0x1f8] sm:$0xff]   ;;  %v1252_v33 = vld [vmem:[%s326_s30] ss:$0 sm:$0xff] }
  0x92   : > { %v1563_v2 = vld [vmem:[%s1988_s26 + $0x130] sm:$0xff]   ;;  %v1567_v6 = vld [vmem:[%s1988_s26 + $0x138] sm:$0xff]  }
  0x93   : > { %1340 = vmatpush3.bf16.msra.mxu0 %v1527_v22  ;;  %v1564_v3 = vld [vmem:[%s1988_s26 + $0x1b0] sm:$0xff]   ;;  %v1568_v7 = vld [vmem:[%s1988_s26 + $0x1b8] sm:$0xff]  }
  0x94   : > { %1362 = vmatpush3.bf16.msra.mxu1 %v1528_v23  ;;  %1341 = vmatprep.subr.bf16.mxu0 %v1529_v24  ;;  %v351_v8 = vld [vmem:[#allocation2 + $0x10] sm:$0xff]  ;;  %v352_v12 = vld [vmem:[#allocation2 + $0x18] sm:$0xff] }
  0x95   : > { %1363 = vmatprep.subr.bf16.mxu1 %v1530_v25  ;;  %v355_v9 = vld [vmem:[#allocation2 + $0x30] sm:$0xff]  ;;  %v356_v13 = vld [vmem:[#allocation2 + $0x38] sm:$0xff] }
  0x96   : > { %v1257_v10 = vcombine.low %v351_v8, %v355_v9  ;;  %v1258_v11 = vcombine.high %v351_v8, %v355_v9  ;;  %v1259_v14 = vcombine.low %v352_v12, %v356_v13  ;;  %v1260_v15 = vcombine.high %v352_v12, %v356_v13  ;;  %v335_v34 = vld [vmem:[%s288_s14] sm:$0xff] }
  0x97   : > { %1342 = vmatpush3.bf16.msra.mxu0 %v1531_v26 }
  0x98   : > { %1364 = vmatpush3.bf16.msra.mxu1 %v1532_v27  ;;  %1343 = vmatprep.subr.bf16.mxu0 %v1533_v28 }
  0x99   : > { %1365 = vmatprep.subr.bf16.mxu1 %v1534_v29 }
  0x9b   : > { %1344 = vmatpush3.bf16.msra.mxu0 %v1535_v30 }
  0x9c   : > { %1366 = vmatpush3.bf16.msra.mxu1 %v1536_v31  ;;  %1373 = vmatprep.subr.bf16.mxu0 %v1537_v40 }
  0x9d   : > { %1395 = vmatprep.subr.bf16.mxu1 %v1538_v41  ;;  %v336_v41 = vld [vmem:[%s288_s14 + $0x8] sm:$0xff] }
  0x9e   : > { %942 = vmatmul.mubr.bf16.vlgmr.msra.gmra.mrb[0].mxu0 %v1253_v35 }
  0x9f   : > { %983 = vmatmul.mubr.bf16.vlgmr.msra.gmra.mrb[0].mxu1 %v1255_v38  ;;  %1374 = vmatpush3.bf16.msra.mxu0 %v1539_v42 }
  0xa0   : > { %1396 = vmatpush3.bf16.msra.mxu1 %v1540_v43  ;;  %1375 = vmatprep.subr.bf16.mxu0 %v1541_v44  ;;  %v343_v43 = vadd.f32 %v1252_v33, %v335_v34 }
  0xa1   : > { %1397 = vmatprep.subr.bf16.mxu1 %v1542_v45  ;;  %1023 = vmatprep.mubr.bf16.mxu0 %v1258_v11 }
  0xa2   : > { %1064 = vmatprep.mubr.bf16.mxu1 %v1260_v15 }
  0xa3   : > { %1376 = vmatpush3.bf16.msra.mxu0 %v1543_v46 }
  0xa4   : > { %1398 = vmatpush3.bf16.msra.mxu1 %v1544_v47  ;;  %1377 = vmatprep.subr.bf16.mxu0 %v1545_v48 }
  0xa5   : > { %1399 = vmatprep.subr.bf16.mxu1 %v1546_v49  ;;  %v344_v49 = vadd.f32 %v1252_v33, %v336_v41 }
  0xa7   : > { %1378 = vmatpush3.bf16.msra.mxu0 %v1547_v50 }
  0xa8   : > { %1400 = vmatpush3.bf16.msra.mxu1 %v1548_v51  ;;  %1379 = vmatprep.subr.bf16.mxu0 %v1549_v52 }
  0xa9   : > { %1401 = vmatprep.subr.bf16.mxu1 %v1550_v53 }
  0xab   : > { %1380 = vmatpush3.bf16.msra.mxu0 %v1551_v54 }
  0xac   : > { %1402 = vmatpush3.bf16.msra.mxu1 %v1552_v55  ;;  %1381 = vmatprep.subr.bf16.mxu0 %v1553_v56 }
  0xad   : > { %1403 = vmatprep.subr.bf16.mxu1 %v1554_v57 }
  0xaf   : > { %1382 = vmatpush3.bf16.msra.mxu0 %v1555_v58 }
  0xb0   : > { %1404 = vmatpush3.bf16.msra.mxu1 %v1556_v59  ;;  %1383 = vmatprep.subr.bf16.mxu0 %v1557_v60 }
  0xb1   : > { %1405 = vmatprep.subr.bf16.mxu1 %v1558_v61 }
  0xb3   : > { %1384 = vmatpush3.bf16.msra.mxu0 %v1559_v62 }
  0xb4   : > { %1406 = vmatpush3.bf16.msra.mxu1 %v1560_v63  ;;  %1385 = vmatprep.subr.bf16.mxu0 %v1561_v0 }
  0xb5   : > { %1407 = vmatprep.subr.bf16.mxu1 %v1562_v1 }
  0xb7   : > { %1386 = vmatpush3.bf16.msra.mxu0 %v1563_v2 }
  0xb8   : > { %1408 = vmatpush3.bf16.msra.mxu1 %v1564_v3  ;;  %1387 = vmatprep.subr.bf16.mxu0 %v1565_v4 }
  0xb9   : > { %1409 = vmatprep.subr.bf16.mxu1 %v1566_v5 }
  0xbb   : > { %1388 = vmatpush3.bf16.msra.mxu0 %v1567_v6 }
  0xbc   : > { %1410 = vmatpush3.bf16.msra.mxu1 %v1568_v7 }
  0xbe   : > { %1024 = vmatmul.mubr.bf16.vlgmr.msra.gmra.mrb[4].mxu0 %v1257_v10 }
  0xbf   : > { %1065 = vmatmul.mubr.bf16.vlgmr.msra.gmra.mrb[4].mxu1 %v1259_v14 }
 0x171   : > { %v1345_v16 = vpop.f32.mrb[0].mxu0 }
 0x172   : > { %v1367_v17 = vpop.f32.mrb[0].mxu1  ;;  %v1346_v18 = vpop.f32.mrb[1].mxu0 }
 0x173   : > { %v1347_v19 = vadd.f32 %v1346_v18, %v1345_v16  ;;  %v1368_v20 = vpop.f32.mrb[1].mxu1  ;;  %v1348_v21 = vpop.f32.mrb[2].mxu0 }
 0x174   : > { %v1369_v22 = vadd.f32 %v1368_v20, %v1367_v17  ;;  %v1370_v23 = vpop.f32.mrb[2].mxu1  ;;  %v1349_v24 = vpop.f32.mrb[3].mxu0 }
 0x175   : > { %v1350_v25 = vadd.f32 %v1349_v24, %v1348_v21  ;;  %v1371_v26 = vpop.f32.mrb[3].mxu1 }
 0x176   : > { %v985_v27 = vadd.f32 %v1369_v22, %v1347_v19  ;;  %v1372_v28 = vadd.f32 %v1371_v26, %v1370_v23 }
 0x178   : > { %v988_v29 = vadd.f32 %v1372_v28, %v1350_v25 }
 0x191   : > { %v1389_v30 = vpop.f32.mrb[4].mxu0 }
 0x192   : > { %v1411_v31 = vpop.f32.mrb[4].mxu1  ;;  %v1390_v32 = vpop.f32.mrb[5].mxu0 }
 0x193   : > { %v1391_v35 = vadd.f32 %v1390_v32, %v1389_v30  ;;  %v1412_v36 = vpop.f32.mrb[5].mxu1  ;;  %v1392_v37 = vpop.f32.mrb[6].mxu0 }
 0x194   : > { %v1413_v38 = vadd.f32 %v1412_v36, %v1411_v31  ;;  %v1414_v39 = vpop.f32.mrb[6].mxu1  ;;  %v1393_v40 = vpop.f32.mrb[7].mxu0 }
 0x195   : > { %v1026_v42 = vadd.f32 %v1391_v35, %v985_v27  ;;  %v1394_v44 = vadd.f32 %v1393_v40, %v1392_v37  ;;  %v1415_v45 = vpop.f32.mrb[7].mxu1 }
 0x196   : > { %v1416_v46 = vadd.f32 %v1415_v45, %v1414_v39 }
 0x197   : > { %v1067_v47 = vadd.f32 %v1413_v38, %v1026_v42  ;;  %v1029_v48 = vadd.f32 %v1394_v44, %v988_v29 }
 0x199   : > { %v1073_v50 = vadd.f32 %v1067_v47, %v343_v43  ;;  %v1070_v51 = vadd.f32 %v1416_v46, %v1029_v48 }
 0x19b   : > { %1569 = vtanh.f32 %v1073_v50  ;;  %v1074_v52 = vadd.f32 %v1070_v51, %v344_v49 }
 0x19d   : > { %1571 = vtanh.f32 %v1074_v52 }
 0x1a5   : > { %v1570_v53 = vpop.eup %1569 }
 0x1a6   : > { %1084 = vst [vmem:[%s320_s29] sm:$0xff] %v1570_v53 }
 0x1a7   : > { %v1572_v54 = vpop.eup %1571 }
 0x1a8   : > { %1085 = vst [vmem:[%s320_s29 + $0x8] sm:$0xff] %v1572_v54 }
 0x1a9   : > { %1674 = shalt.err (!%p1671_p12)
}
 0x1aa   : > { %s1675_s11 = scalar_lea.hbm %s2068_s3, 256  ;;  %s1679_s25 = scalar_lea.hbm %s2123_s4, 512 }
 0x1ab   : > { %p1676_p10 = scmp.ne.s32.totalorder %s2068_s3, %s1675_s11  ;;  %p1680_p5 = scmp.lt.u32.totalorder %s2068_s3, %s2123_s4 }
 0x1ac   : > { %p1681_p1 = scmp.lt.u32.totalorder %s1679_s25, %s1675_s11  ;;  %p1683_p13 = scmp.lt.u32.totalorder %s1675_s11, %s2068_s3 }
 0x1ad   : > { %p1677_p9 = pnand %p1676_p10, %p2146_p4 }
 0x1ae   : > { %p1682_p8 = por %p1681_p1, %p1680_p5 }
 0x1af   : > { %p1678_p11 = pneg %p1677_p9 }
 0x1b0   : > { %p1684_p7 = por %p1683_p13, %p1682_p8 }
 0x1b2   : > { %p1685_p0 = pnand %p1684_p7, %p1678_p11 }
 0x1b4   : > { %1688 = shalt.err (!%p1685_p0)
}
 0x1b5   : > { %s1760_s30 = smov 128   ;;  %s1761_s14 = smov 256  }
 0x1b6   : > { %s1762_s23 = smov 8  }
 0x1b7   : > { %1425 = dma.vmem_to_hbm [thread:$0]  (%p2146_p4), %s2070_s28, 256, %s2068_s3, %s1087_s21, %s1760_s30, %s1761_s14, %s1762_s23  }
 0x1b8 PF: > { %s1117_s29 = sand.u32 1, %s1727_s15   ;;  %p2147_p3 = scmp.ne.s32.totalorder %s2137_s8, 0 }
 0x1b9   : > { %p2148_p2 = scmp.ge.s32.totalorder %s1747_s20, 2  ;;  %s1118_s6 = scalar_lea.sflag [#allocation4], %s1117_s29 }
 0x1bb   : > { %p1439_p6 = pnand %p2148_p2, %p2147_p3 }
 0x1bd   : > { %1722 = dma.done.wait (!%p1439_p6), %s1118_s6, 256  }
 0x1be   : > { %1724 = vsyncadd (!%p1439_p6), %s1118_s6, 4294967040  ;;  %s21_s20 = sadd.s32 1, %s1747_s20   ;;  %s2149_s5 = sld [smem:[#allocation12_spill]] }
 0x1bf   : > { %p18_p12 = scmp.ge.s32.totalorder %s21_s20, 4   ;;  %s2150_s15 = smov %s1731_s16 }
 0x1c0   : > { %s2151_s16 = smov %s1735_s17  ;;  %s2152_s17 = smov %s1836_s27 }
 0x1c1   : > { %s2153_s18 = smov %s1743_s19  ;;  %20 = sbr.rel (!%p18_p12) target bundleno = 10 (0xa), region = 109 }
 0x1c4   : > { %s2154_s19 = smov %s2149_s5 }
 0x1c8   :  { %1123 = vsyncpa [#allocation3], 1 }
 0x1c9   :  { %1125 = vsyncpa [#allocation3 + $0x1], 1 }
 0x1ca   :  { %1126 = vsyncpa [#allocation6], 1 }
 0x1cb   :  { %1128 = vsyncpa [#allocation6 + $0x1], 1 }
 0x1cc   :  { %1129 = vsyncpa [#allocation4], 1 }
 0x1cd   :  { %1131 = vsyncpa [#allocation4 + $0x1], 1 }

</bundles_post_ra>
